<compile_context>
chip_gen: v7x
topology: tpu7x:2x2x1
jax: 0.10.0
libtpu: 0.0.40
codegen_flags: <defaults>
</compile_context>

<pallas_src>
import functools

import jax
import jax.numpy as jnp
from jax import lax
from jax.experimental import pallas as pl
from jax.experimental.pallas import tpu as pltpu


_NEG_PAD = -1e30  # finite "minus infinity" for masked softmax logits


def _round_up(x, m):
    return (x + m - 1) // m * m


def _spatial_gather_kernel(aux_ref, feat_ref, out_ref, m_ref, l_ref, acc_ref,
                           *, hw, thw, needs_mask):
    """One (batch, C-chunk) output block, accumulated over HW tiles.

    aux_ref : (1, K, THW)   logits tile
    feat_ref: (1, TC, THW)  feature tile (native dtype)
    out_ref : (1, K, TC)    context block (resident across the HW axis)
    m_ref   : (K, 1)  f32   running row max
    l_ref   : (K, 1)  f32   running row sum of exp
    acc_ref : (K, TC) f32   unnormalized context accumulator
    """
    t = pl.program_id(2)

    @pl.when(t == 0)
    def _init():
        m_ref[...] = jnp.full_like(m_ref, -jnp.inf)
        l_ref[...] = jnp.zeros_like(l_ref)
        acc_ref[...] = jnp.zeros_like(acc_ref)

    a = aux_ref[0].astype(jnp.float32)   # (K, THW)  softmax stats strictly f32
    feat = feat_ref[0]                   # (TC, THW) native dtype

    if needs_mask:
        # HW does not divide into THW tiles: trailing columns of the last tile
        # hold stale VMEM.  Mask logits to ~-inf (weight -> 0) AND the features
        # themselves to 0 (stale data may be NaN/Inf; 0*NaN would poison the
        # MXU contraction).  One VPU select per tile - negligible.
        valid = (t * thw + lax.broadcasted_iota(jnp.int32, (1, thw), 1)) < hw
        a = jnp.where(valid, a, _NEG_PAD)
        feat = jnp.where(valid, feat, jnp.zeros_like(feat))

    m_prev = m_ref[...]                                           # (K, 1)
    m_new = jnp.maximum(m_prev, jnp.max(a, axis=-1, keepdims=True))
    corr = jnp.exp(m_prev - m_new)                                # (K, 1)
    e = jnp.exp(a - m_new)                                        # (K, THW)

    l_ref[...] = corr * l_ref[...] + jnp.sum(e, axis=-1, keepdims=True)

    # (K, THW) x (TC, THW) contracting THW -> (K, TC); f32 accumulate on MXU.
    # RHS contracts its lane dim ("B-transposed" form) so the feature tile is
    # consumed exactly as streamed from HBM - no wrapper-side transpose.
    part = lax.dot_general(
        e.astype(feat.dtype), feat,
        dimension_numbers=(((1,), (1,)), ((), ())),
        preferred_element_type=jnp.float32)

    acc_ref[...] = corr * acc_ref[...] + part
    m_ref[...] = m_new

    @pl.when(t == pl.num_programs(2) - 1)
    def _finalize():
        # Normalization touches only K scalars per channel chunk.
        inv = pl.reciprocal(l_ref[...], approx=False)             # (K, 1)
        out_ref[0] = (acc_ref[...] * inv).astype(out_ref.dtype)


def _tpu_mem_profile():
    """(vmem_capacity_bytes, tensorcores_per_chip) with conservative fallbacks."""
    vmem_cap = 64 << 20        # safe default: v7x per-TC VMEM
    n_tc = 1
    try:
        info = pltpu.get_tpu_info()
        cap = int(getattr(info, "vmem_capacity_bytes", vmem_cap))
        vmem_cap = min(max(cap, 32 << 20), 128 << 20)
    except Exception:
        pass
    try:
        if "v7" in jax.devices()[0].device_kind.lower():
            n_tc = 2
    except Exception:
        pass
    return vmem_cap, n_tc


def _choose_hw_tile(HW, K, tcc, aux_itemsize, feat_itemsize,
                    input_budget_bytes, max_tile):
    """Largest HW tile (multiple of 128) whose double-buffered inputs fit."""
    hw128 = _round_up(HW, 128)
    bytes_per_col = 2 * (K * aux_itemsize + tcc * feat_itemsize)  # x2: dbl-buffer
    cap = max(128, (input_budget_bytes // bytes_per_col) // 128 * 128)
    return int(min(hw128, cap, max_tile))


def spatial_gather(bb_feats, aux_out):
    """bb_feats: (B, C, H, W), aux_out: (B, K, H, W) -> (B, C, K, 1)."""
    B, C, H, W = bb_feats.shape
    _, K, _, _ = aux_out.shape
    HW = H * W
    out_dtype = bb_feats.dtype

    # Flatten spatial only - pure metadata reshapes, no HBM copies, no padding.
    aux = aux_out.reshape(B, K, HW)
    feats = bb_feats.reshape(B, C, HW)

    vmem_cap, n_tc = _tpu_mem_profile()
    if vmem_cap >= (100 << 20):          # v5e / v6e: 128 MiB VMEM
        input_budget, max_tile = 48 << 20, 8192
    else:                                # v7x (64 MiB/TC) or unknown
        input_budget, max_tile = 24 << 20, 4096

    # Optional C split: only worthwhile on dual-TensorCore chips (v7x) when the
    # batch axis alone cannot keep both cores busy; otherwise it just re-reads
    # aux and duplicates the softmax statistics per chunk.
    n_c = 1
    if n_tc >= 2 and B < n_tc and C >= 512 and C % 256 == 0:
        n_c = 2
    tcc = C // n_c

    # Size the HW tile from what is actually loaded per step (tcc, not C).
    thw = _choose_hw_tile(HW, K, tcc, aux.dtype.itemsize, feats.dtype.itemsize,
                          input_budget, max_tile)
    n_hw = pl.cdiv(HW, thw)
    needs_mask = (HW % thw) != 0         # ragged last HW tile -> mask in-kernel

    kernel = functools.partial(
        _spatial_gather_kernel, hw=HW, thw=thw, needs_mask=needs_mask)

    # VMEM budget: double-buffered input tiles + resident output + scratch +
    # f32 exp intermediates + margin; capped below physical VMEM so Mosaic
    # keeps headroom for its internal scratch.
    vmem_bytes = (
        2 * thw * (K * aux.dtype.itemsize + tcc * feats.dtype.itemsize)
        + 2 * K * tcc * jnp.dtype(out_dtype).itemsize
        + (2 * K + K * tcc) * 4
        + 2 * K * thw * 4
        + (4 << 20))
    vmem_bytes = int(min(max(vmem_bytes, 16 << 20),
                         max(16 << 20, vmem_cap - (12 << 20))))

    ctx = pl.pallas_call(
        kernel,
        out_shape=jax.ShapeDtypeStruct((B, K, C), out_dtype),
        grid_spec=pltpu.PrefetchScalarGridSpec(
            num_scalar_prefetch=0,
            grid=(B, n_c, n_hw),
            in_specs=[
                pl.BlockSpec((1, K, thw), lambda b, c, t: (b, 0, t)),
                pl.BlockSpec((1, tcc, thw), lambda b, c, t: (b, c, t)),
            ],
            out_specs=pl.BlockSpec((1, K, tcc), lambda b, c, t: (b, 0, c)),
            scratch_shapes=[
                pltpu.VMEM((K, 1), jnp.float32),    # running max
                pltpu.VMEM((K, 1), jnp.float32),    # running sum of exp
                pltpu.VMEM((K, tcc), jnp.float32),  # unnormalized context
            ],
        ),
        compiler_params=pltpu.CompilerParams(
            dimension_semantics=("parallel", "parallel", "arbitrary"),
            vmem_limit_bytes=vmem_bytes,
        ),
    )(aux, feats)

    # Tiny (B, K, C) -> (B, C, K, 1) transpose stays in the wrapper so the
    # kernel's output stores remain lane-dense on the C axis.
    return ctx.transpose(0, 2, 1)[:, :, :, None]


def _reference(bb_feats, aux_out):
    B, K, H, W = aux_out.shape
    C = bb_feats.shape[1]
    aux = aux_out.reshape(B, K, H * W)
    feats = bb_feats.reshape(B, C, H * W).transpose(0, 2, 1)
    p = jax.nn.softmax(aux, axis=2)
    ctx = jnp.einsum('bks,bsc->bkc', p, feats, precision=lax.Precision.HIGHEST)
    return ctx.transpose(0, 2, 1)[:, :, :, None]


if __name__ == "__main__":
    key = jax.random.PRNGKey(0)
    k1, k2 = jax.random.split(key)

    B, C, K, H, W = 2, 32, 4, 16, 16
    bb_feats = jax.random.normal(k1, (B, C, H, W), dtype=jnp.float32)
    aux_out = jax.random.normal(k2, (B, K, H, W), dtype=jnp.float32)

    out = spatial_gather(bb_feats, aux_out)
    out = jax.block_until_ready(out)

    ref = _reference(bb_feats, aux_out)
    assert out.shape == (B, C, K, 1), out.shape
    # 2e-3 tolerance covers MXU accumulation-order / bf16-weight-cast
    # differences vs the XLA reference einsum; both accumulate in f32.
    assert jnp.allclose(out, ref, atol=2e-3, rtol=2e-3), float(
        jnp.max(jnp.abs(out - ref)))

    print("KERNEL_OK")
</pallas_src>

<mosaic_0001>
module attributes {stable_mosaic.version = 11 : i64} {
  func.func @_spatial_gather_kernel(%arg0: i32, %arg1: i32, %arg2: i32, %arg3: memref<1x4x256xf32, #tpu.memory_space<vmem>>, %arg4: memref<1x32x256xf32, #tpu.memory_space<vmem>>, %arg5: memref<1x4x32xf32, #tpu.memory_space<vmem>>, %arg6: memref<4x1xf32, #tpu.memory_space<vmem>>, %arg7: memref<4x1xf32, #tpu.memory_space<vmem>>, %arg8: memref<4x32xf32, #tpu.memory_space<vmem>>) attributes {dimension_semantics = [#tpu.dimension_semantics<parallel>, #tpu.dimension_semantics<parallel>, #tpu.dimension_semantics<arbitrary>], iteration_bounds = array<i64: 2, 1, 1>, scalar_prefetch = 0 : i64, scratch_operands = 3 : i64, tpu.core_type = #tpu.core_type<tc>, window_params = [{transform_indices = @transform_0, window_bounds = array<i64: 1, 4, 256>}, {transform_indices = @transform_1, window_bounds = array<i64: 1, 32, 256>}, {transform_indices = @transform_2, window_bounds = array<i64: 1, 4, 32>}]} {
    %c0_i32 = arith.constant 0 : i32
    %0 = arith.cmpi eq, %arg2, %c0_i32 : i32
    %1 = arith.extui %0 : i1 to i32
    %c0_i32_0 = arith.constant 0 : i32
    %2 = arith.cmpi ne, %1, %c0_i32_0 : i32
    scf.if %2 {
      %cst_22 = arith.constant 0xFF800000 : f32
      %32 = vector.broadcast %cst_22 : f32 to vector<4x1xf32>
      %c0_23 = arith.constant 0 : index
      %c0_24 = arith.constant 0 : index
      %33 = vector.load %arg6[%c0_23, %c0_24] : memref<4x1xf32, #tpu.memory_space<vmem>>, vector<4x1xf32>
      tpu.vector_store %arg6[%c0_23, %c0_24], %32 {strides = array<i32>} : memref<4x1xf32, #tpu.memory_space<vmem>>, vector<4x1xf32>,
      %cst_25 = arith.constant 0.000000e+00 : f32
      %34 = vector.broadcast %cst_25 : f32 to vector<4x1xf32>
      %c0_26 = arith.constant 0 : index
      %c0_27 = arith.constant 0 : index
      %35 = vector.load %arg7[%c0_26, %c0_27] : memref<4x1xf32, #tpu.memory_space<vmem>>, vector<4x1xf32>
      tpu.vector_store %arg7[%c0_26, %c0_27], %34 {strides = array<i32>} : memref<4x1xf32, #tpu.memory_space<vmem>>, vector<4x1xf32>,
      %cst_28 = arith.constant 0.000000e+00 : f32
      %36 = vector.broadcast %cst_28 : f32 to vector<4x32xf32>
      %c0_29 = arith.constant 0 : index
      %c0_30 = arith.constant 0 : index
      %37 = vector.load %arg8[%c0_29, %c0_30] : memref<4x32xf32, #tpu.memory_space<vmem>>, vector<4x32xf32>
      tpu.vector_store %arg8[%c0_29, %c0_30], %36 {strides = array<i32>} : memref<4x32xf32, #tpu.memory_space<vmem>>, vector<4x32xf32>,
    } else {
    }
    %c0 = arith.constant 0 : index
    %c0_1 = arith.constant 0 : index
    %c0_2 = arith.constant 0 : index
    %3 = vector.load %arg3[%c0, %c0_1, %c0_2] : memref<1x4x256xf32, #tpu.memory_space<vmem>>, vector<1x4x256xf32>
    %4 = vector.shape_cast %3 : vector<1x4x256xf32> to vector<4x256xf32>
    %c0_3 = arith.constant 0 : index
    %c0_4 = arith.constant 0 : index
    %c0_5 = arith.constant 0 : index
    %5 = vector.load %arg4[%c0_3, %c0_4, %c0_5] : memref<1x32x256xf32, #tpu.memory_space<vmem>>, vector<1x32x256xf32>
    %6 = vector.shape_cast %5 : vector<1x32x256xf32> to vector<32x256xf32>
    %c0_6 = arith.constant 0 : index
    %c0_7 = arith.constant 0 : index
    %7 = vector.load %arg6[%c0_6, %c0_7] : memref<4x1xf32, #tpu.memory_space<vmem>>, vector<4x1xf32>
    %cst = arith.constant dense<0xFF800000> : vector<4xf32>
    %8 = vector.multi_reduction <maximumf>, %4, %cst [1] : vector<4x256xf32> to vector<4xf32>
    %9 = vector.shape_cast %8 : vector<4xf32> to vector<4x1xf32>
    %10 = arith.maximumf %7, %9 : vector<4x1xf32>
    %11 = arith.subf %7, %10 : vector<4x1xf32>
    %12 = math.exp %11 : vector<4x1xf32>
    %13 = vector.broadcast %10 : vector<4x1xf32> to vector<4x256xf32>
    %14 = arith.subf %4, %13 : vector<4x256xf32>
    %15 = math.exp %14 : vector<4x256xf32>
    %c0_8 = arith.constant 0 : index
    %c0_9 = arith.constant 0 : index
    %16 = vector.load %arg7[%c0_8, %c0_9] : memref<4x1xf32, #tpu.memory_space<vmem>>, vector<4x1xf32>
    %17 = arith.mulf %12, %16 : vector<4x1xf32>
    %cst_10 = arith.constant dense<0.000000e+00> : vector<4xf32>
    %18 = vector.multi_reduction <add>, %15, %cst_10 [1] : vector<4x256xf32> to vector<4xf32>
    %19 = vector.shape_cast %18 : vector<4xf32> to vector<4x1xf32>
    %20 = arith.addf %17, %19 : vector<4x1xf32>
    %c0_11 = arith.constant 0 : index
    %c0_12 = arith.constant 0 : index
    %21 = vector.load %arg7[%c0_11, %c0_12] : memref<4x1xf32, #tpu.memory_space<vmem>>, vector<4x1xf32>
    tpu.vector_store %arg7[%c0_11, %c0_12], %20 {strides = array<i32>} : memref<4x1xf32, #tpu.memory_space<vmem>>, vector<4x1xf32>,
    %cst_13 = arith.constant dense<0.000000e+00> : vector<4x32xf32>
    %22 = tpu.matmul %15, %6, %cst_13 {dimension_numbers = #tpu.dot_dimension_numbers<[1], [1], [0], [0], [0, 0, 1, 0], [], []>} : vector<4x256xf32>, vector<32x256xf32>, vector<4x32xf32> -> vector<4x32xf32>
    %c0_14 = arith.constant 0 : index
    %c0_15 = arith.constant 0 : index
    %23 = vector.load %arg8[%c0_14, %c0_15] : memref<4x32xf32, #tpu.memory_space<vmem>>, vector<4x32xf32>
    %24 = vector.broadcast %12 : vector<4x1xf32> to vector<4x32xf32>
    %25 = arith.mulf %24, %23 : vector<4x32xf32>
    %26 = arith.addf %25, %22 : vector<4x32xf32>
    %c0_16 = arith.constant 0 : index
    %c0_17 = arith.constant 0 : index
    %27 = vector.load %arg8[%c0_16, %c0_17] : memref<4x32xf32, #tpu.memory_space<vmem>>, vector<4x32xf32>
    tpu.vector_store %arg8[%c0_16, %c0_17], %26 {strides = array<i32>} : memref<4x32xf32, #tpu.memory_space<vmem>>, vector<4x32xf32>,
    %c0_18 = arith.constant 0 : index
    %c0_19 = arith.constant 0 : index
    %28 = vector.load %arg6[%c0_18, %c0_19] : memref<4x1xf32, #tpu.memory_space<vmem>>, vector<4x1xf32>
    tpu.vector_store %arg6[%c0_18, %c0_19], %10 {strides = array<i32>} : memref<4x1xf32, #tpu.memory_space<vmem>>, vector<4x1xf32>,
    %c0_i32_20 = arith.constant 0 : i32
    %29 = arith.cmpi eq, %arg2, %c0_i32_20 : i32
    %30 = arith.extui %29 : i1 to i32
    %c0_i32_21 = arith.constant 0 : i32
    %31 = arith.cmpi ne, %30, %c0_i32_21 : i32
    scf.if %31 {
      %c0_22 = arith.constant 0 : index
      %c0_23 = arith.constant 0 : index
      %32 = vector.load %arg7[%c0_22, %c0_23] : memref<4x1xf32, #tpu.memory_space<vmem>>, vector<4x1xf32>
      %33 = tpu.reciprocal %32 : vector<4x1xf32> -> vector<4x1xf32>
      %c0_24 = arith.constant 0 : index
      %c0_25 = arith.constant 0 : index
      %34 = vector.load %arg8[%c0_24, %c0_25] : memref<4x32xf32, #tpu.memory_space<vmem>>, vector<4x32xf32>
      %35 = vector.broadcast %33 : vector<4x1xf32> to vector<4x32xf32>
      %36 = arith.mulf %34, %35 : vector<4x32xf32>
      %c0_26 = arith.constant 0 : index
      %c0_27 = arith.constant 0 : index
      %c0_28 = arith.constant 0 : index
      %37 = vector.load %arg5[%c0_26, %c0_27, %c0_28] : memref<1x4x32xf32, #tpu.memory_space<vmem>>, vector<1x4x32xf32>
      %38 = vector.shape_cast %37 : vector<1x4x32xf32> to vector<4x32xf32>
      %39 = vector.shape_cast %36 : vector<4x32xf32> to vector<1x4x32xf32>
      tpu.vector_store %arg5[%c0_26, %c0_27, %c0_28], %39 {strides = array<i32>} : memref<1x4x32xf32, #tpu.memory_space<vmem>>, vector<1x4x32xf32>,
    } else {
    }
    return
  }
  func.func @transform_0(%arg0: i32, %arg1: i32, %arg2: i32) -> (i32, i32, i32) {
    %c0_i32 = arith.constant 0 : i32
    %c0_i32_0 = arith.constant 0 : i32
    return %arg0, %c0_i32, %arg2 : i32, i32, i32
  }
  func.func @transform_1(%arg0: i32, %arg1: i32, %arg2: i32) -> (i32, i32, i32) {
    %c0_i32 = arith.constant 0 : i32
    return %arg0, %arg1, %arg2 : i32, i32, i32
  }
  func.func @transform_2(%arg0: i32, %arg1: i32, %arg2: i32) -> (i32, i32, i32) {
    %c0_i32 = arith.constant 0 : i32
    %c0_i32_0 = arith.constant 0 : i32
    return %arg0, %c0_i32, %arg1 : i32, i32, i32
  }
}

</mosaic_0001>

<bundles_post_ra>
// kernel: tpu_custom_call.1
= control target key start
LH: loop header
LB: loop body
LE: loop exit
PB: predicated region body
PF: predicated region fallthrough
CT: control target
= control target key end

     0   :  { %7 = vsyncpa [#allocation6], 0  ;;  %s1046_s0 = inlined_call_operand.hbm [shape: f32[2,4,256], index: 0, kind: input, shape index: {}]   ;;  %s1047_s1 = inlined_call_operand.hbm [shape: f32[2,32,256], index: 1, kind: input, shape index: {}]   ;;  %s1048_s2 = inlined_call_operand.hbm [shape: f32[2,4,32], index: 2, kind: output, shape index: {}]  }
   0x1   :  { %9 = vsyncpa [#allocation6 + $0x1], 0 }
   0x2   :  { %10 = vsyncpa [#allocation9], 0 }
   0x3   :  { %12 = vsyncpa [#allocation9 + $0x1], 0 }
   0x4   :  { %13 = vsyncpa [#allocation7], 0 }
   0x5   :  { %15 = vsyncpa [#allocation7 + $0x1], 0  ;;  %s801_s9 = smov 0   ;;  %s803_s10 = smov 0  }
   0x6   :  { %s805_s11 = smov 0   ;;  %s807_s12 = smov 0  }
   0x7   :  { %s809_s13 = smov 0   ;;  %s811_s14 = smov 0  }
   0x8 LB: > { %s519_s15 = sadd.s32 4294967295, %s775_s14   ;;  %s520_s16 = sadd.s32 4294967294, %s775_s14   ;;  %s775_s14 = sphi %s811_s14, %s21_s14   ;;  %s771_s13 = sphi %s809_s13, %s1067_s13   ;;  %s767_s12 = sphi %s807_s12, %s1066_s12   ;;  %s763_s11 = sphi %s805_s11, %s1065_s11   ;;  %s759_s10 = sphi %s803_s10, %s1064_s10   ;;  %s755_s9 = sphi %s801_s9, %s1063_s9  }
   0x9   : > { %s40_s17 = sadd.s32 1, %s771_s13  ;;  %s49_s18 = sadd.s32 1, %s763_s11 }
   0xa   : > { %p42_p0 = scmp.ge.s32.totalorder %s40_s17, 2  ;;  %p56_p1 = scmp.ne.s32.totalorder %s763_s11, %s759_s10 }
   0xb   : > { %p57_p2 = scmp.eq.s32.totalorder %s775_s14, 0  ;;  %p62_p3 = scmp.ne.s32.totalorder %s759_s10, %s755_s9 }
   0xc   : > { %s1069_s17 = smov (%p42_p0, %s40_s17), 0  ;;  %p63_p5 = scmp.eq.s32.totalorder %s519_s15, 0 }
   0xd   : > { %p842_p4 = por %p57_p2, %p56_p1  ;;  %s44_s20 = ssub.s32 %s771_s13, %s1069_s17 }
   0xe   : > { %p118_p6 = scmp.eq.s32.totalorder %s519_s15, 1  ;;  %p47_p7 = scmp.eq.s32.totalorder %s44_s20, 0 }
   0xf   : > { %p848_p8 = por %p63_p5, %p62_p3  ;;  %p124_p10 = scmp.eq.s32.totalorder %s520_s16, 1 }
  0x10   : > { %p852_p9 = por %p118_p6, %p56_p1  ;;  %p564_p13 = scmp.lt.s32.totalorder %s775_s14, 2 }
  0x11   : > { %s1052_s21 = scalar_select %p848_p8, 1, 0 }
  0x12   : > { %s1053_s22 = scalar_select %p852_p9, 1, 0 }
  0x13   : > { %s857_s23 = scalar_select %p47_p7, %s763_s11, %s49_s18  }
  0x14   : > { %p859_p11 = por %p124_p10, %p62_p3  ;;  %s866_s25 = sand.u32 1, %s763_s11  }
  0x15   : > { %s523_s26 = sshll.u32 %s866_s25, 3  ;;  %s537_s27 = sshll.u32 %s771_s13, 7 }
  0x16   : > { %s1054_s24 = scalar_select %p859_p11, 1, 0 }
  0x17   : > { %s873_s30 = scalar_lea.hbm %s1046_s0, %s537_s27  ;;  %s148_s3 = scalar_lea.vmem [#allocation5], %s523_s26 }
  0x18   : > { %s158_s4 = sshll.u32 %s148_s3, 4  ;;  %p879_p0 = pnand %p564_p13, %p842_p4  ;;  %s875_s4 = int_to_ptr.vmem [resolvable:$true] %s158_s4 }
  0x19   : > { %s145_s6 = scalar_lea.sflag [#allocation6], %s866_s25  ;;  %s629_s7 = scalar_lea.hbm %s873_s30, 128 }
  0x1a   : > { %p630_p3 = scmp.ne.s32.totalorder %s873_s30, %s629_s7  ;;  %p631_p5 = pneg %p879_p0 }
  0x1b   : > { %s634_s16 = scalar_lea.hbm %s1046_s0, 256  ;;  %p635_p4 = scmp.lt.u32.totalorder %s873_s30, %s1046_s0 }
  0x1c   : > { %p632_p6 = pnand %p631_p5, %p630_p3  ;;  %p636_p10 = scmp.lt.u32.totalorder %s634_s16, %s629_s7 }
  0x1d   : > { %p638_p12 = scmp.lt.u32.totalorder %s629_s7, %s873_s30 }
  0x1e   : > { %p633_p7 = pneg %p632_p6  ;;  %p637_p13 = por %p636_p10, %p635_p4 }
  0x20   : > { %p639_p1 = por %p638_p12, %p637_p13 }
  0x22   : > { %p640_p2 = pnand %p639_p1, %p633_p7 }
  0x24   : > { %643 = shalt.err (!%p640_p2)
}
  0x25   : > { %s644_s20 = scalar_lea.vmem %s875_s4, 128  ;;  %s777_s26 = smov [#allocation5]  }
  0x26   : > { %p645_p3 = scmp.ne.s32.totalorder %s875_s4, %s644_s20  ;;  %s649_s27 = sshll.u32 %s777_s26, 4  ;;  %s650_s27 = int_to_ptr.vmem [resolvable:$false] %s649_s27 }
  0x27   : > { %s651_s28 = scalar_lea.vmem %s650_s27, 256  ;;  %p652_p9 = scmp.lt.s32.totalorder %s875_s4, %s650_s27 }
  0x28   : > { %p647_p6 = pnand %p645_p3, %p631_p5  ;;  %p653_p4 = scmp.lt.s32.totalorder %s651_s28, %s644_s20 }
  0x2a   : > { %p648_p11 = pneg %p647_p6  ;;  %p654_p10 = por %p653_p4, %p652_p9 }
  0x2c   : > { %p655_p12 = pnand %p654_p10, %p648_p11 }
  0x2e   : > { %658 = shalt.err (!%p655_p12)
}
  0x2f   : > { %556 = dma.hbm_to_vmem [thread:$0]  (!%p879_p0), %s873_s30, 128, %s875_s4, %s145_s6  }
  0x30   : > { %p1056_p1 = scmp.lt.s32.totalorder %s775_s14, 3  ;;  %p1057_p2 = scmp.ge.s32.totalorder %s775_s14, 1 }
  0x31   : > { %s526_s3 = sshll.u32 %s866_s25, 6  ;;  %s538_s7 = sshll.u32 %s771_s13, 10 }
  0x32   : > { %p915_p7 = pnand %p1057_p2, %p1056_p1  ;;  %s924_s16 = scalar_lea.hbm %s1047_s1, %s538_s7 }
  0x33   : > { %s169_s18 = scalar_lea.vmem [#allocation8], %s526_s3  ;;  %s166_s30 = scalar_lea.sflag [#allocation9], %s866_s25 }
  0x34   : > { %s181_s19 = sshll.u32 %s169_s18, 4  ;;  %s659_s4 = scalar_lea.hbm %s924_s16, 1024  ;;  %s926_s19 = int_to_ptr.vmem [resolvable:$true] %s181_s19 }
  0x35   : > { %p660_p9 = scmp.ne.s32.totalorder %s924_s16, %s659_s4  ;;  %s664_s26 = scalar_lea.hbm %s1047_s1, 2048 }
  0x36   : > { %p665_p3 = scmp.lt.u32.totalorder %s924_s16, %s1047_s1  ;;  %p666_p6 = scmp.lt.u32.totalorder %s664_s26, %s659_s4 }
  0x37   : > { %p662_p11 = pnand %p660_p9, %p631_p5  ;;  %p668_p10 = scmp.lt.u32.totalorder %s659_s4, %s924_s16 }
  0x38   : > { %p667_p4 = por %p666_p6, %p665_p3 }
  0x39   : > { %p663_p13 = pneg %p662_p11 }
  0x3a   : > { %p669_p12 = por %p668_p10, %p667_p4 }
  0x3c   : > { %p670_p1 = pnand %p669_p12, %p663_p13 }
  0x3e   : > { %673 = shalt.err (!%p670_p1)
}
  0x3f   : > { %s674_s3 = scalar_lea.vmem %s926_s19, 1024  ;;  %s778_s7 = smov [#allocation8]  }
  0x40   : > { %p675_p2 = scmp.ne.s32.totalorder %s926_s19, %s674_s3  ;;  %s679_s8 = sshll.u32 %s778_s7, 4  ;;  %s680_s8 = int_to_ptr.vmem [resolvable:$false] %s679_s8 }
  0x41   : > { %s681_s15 = scalar_lea.vmem %s680_s8, 2048  ;;  %p682_p8 = scmp.lt.s32.totalorder %s926_s19, %s680_s8 }
  0x42   : > { %p677_p9 = pnand %p675_p2, %p631_p5  ;;  %p683_p3 = scmp.lt.s32.totalorder %s681_s15, %s674_s3 }
  0x44   : > { %p678_p11 = pneg %p677_p9  ;;  %p684_p6 = por %p683_p3, %p682_p8 }
  0x46   : > { %p685_p4 = pnand %p684_p6, %p678_p11 }
  0x48   : > { %688 = shalt.err (!%p685_p4)
}
  0x49   : > { %s779_s18 = smov 256   ;;  %s780_s4 = smov 16  }
  0x4a   : > { %559 = dma.hbm_to_vmem [thread:$0]  (!%p879_p0), %s924_s16, 1024, %s926_s19, %s166_s30, %s779_s18, %s779_s18, %s780_s4  }
  0x4b   : > { %193 = sbr.rel (%p915_p7) target bundleno = 693 (0x2b5), region = 28  ;;  %s957_s6 = sand.u32 (!%p915_p7), 1, %s759_s10  }
  0x4c   : > { %s530_s20 = sshll.u32 (!%p915_p7), %s957_s6, 3  ;;  %s196_s26 = scalar_lea.sflag (!%p915_p7), [#allocation6], %s957_s6 }
  0x4d   : > { %s199_s27 = scalar_lea.vmem (!%p915_p7), [#allocation5], %s530_s20  ;;  %p1059_p8 = scmp.ne.s32.totalorder (!%p915_p7), %s1052_s21, 0 }
  0x52   : > { %742 = dma.done.wait (%p1059_p8), %s196_s26, 128  }
  0x53   : > { %744 = vsyncadd (%p1059_p8), %s196_s26, 4294967168  ;;  %s531_s25 = sshll.u32 %s957_s6, 6  ;;  %s205_s5 = scalar_lea.sflag [#allocation9], %s957_s6 }
  0x54   : > { %s967_s29 = scalar_lea.vmem [#allocation8], %s531_s25 }
  0x55   : > { %746 = dma.done.wait (%p1059_p8), %s205_s5, 1024  }
  0x56   : > { %748 = vsyncadd (%p1059_p8), %s205_s5, 4294966272  ;;  %vm241_vm0 = vcmask 3072   ;;  %v781_v0 = vmov -inf   ;;  %vm259_vm1 = vcmask 1043456   ;;  %v246_v1 = vld [vmem:[%s199_s27] sm:$0xff]  ;;  %v782_v6 = vmov 0  }
  0x57   : > { %242 = vst.msk [vmem:[#allocation2] sm:$0xf] %vm241_vm0, %v781_v0  ;;  %v257_v2 = vcombine.high %v246_v1, %v246_v1  ;;  %v260_v3 = vsel %vm259_vm1, %v246_v1, -inf  ;;  %620 = vset.pattern.permute.xlu0 %v782_v6  ;;  %621 = vset.pattern.permute.xlu1 %v782_v6  ;;  %v783_v7 = vmov 0.0   ;;  %v248_v12 = vld [vmem:[%s967_s29 + $0x8] sm:$0xff]  ;;  %v250_v13 = vld [vmem:[%s967_s29 + $0x18] sm:$0xff]  ;;  %v276_v26 = vlaneseq }
  0x58   : > { %243 = vst.msk [vmem:[#allocation3] sm:$0xf] %vm241_vm0, %v783_v7  ;;  %v539_v14 = vpack.c.bf16 %v250_v13, %v248_v12  ;;  %v247_v15 = vld [vmem:[%s967_s29] sm:$0xff]  ;;  %v249_v16 = vld [vmem:[%s967_s29 + $0x10] sm:$0xff]  ;;  %v252_v18 = vld [vmem:[%s967_s29 + $0x28] sm:$0xff]  ;;  %vm244_vm2 = vcmask 257024  }
  0x59   : > { %v261_v4 = vsel %vm259_vm1, %v257_v2, -inf  ;;  %v541_v17 = vpack.c.bf16 %v249_v16, %v247_v15  ;;  %v254_v19 = vld [vmem:[%s967_s29 + $0x38] sm:$0xff]  ;;  %v251_v20 = vld [vmem:[%s967_s29 + $0x20] sm:$0xff]  ;;  %v253_v22 = vld [vmem:[%s967_s29 + $0x30] sm:$0xff]  ;;  %v784_v24 = vmov 839922192  }
  0x5a   : > { %v262_v5 = vmax.f32 %v260_v3, %v261_v4  ;;  %540 = vmatprep.subr.bf16.mxu0 %v539_v14  ;;  %v543_v21 = vpack.c.bf16 %v254_v19, %v252_v18  ;;  %v545_v23 = vpack.c.bf16 %v253_v22, %v251_v20  ;;  %v274_v25 = vunpack.c.l.s4 %v784_v24  ;;  %245 = vst.msk [vmem:[#allocation4] sm:$0xf] %vm244_vm2, %v783_v7  ;;  %s532_s21 = sshll.u32 %s957_s6, 2  ;;  %s534_s16 = sshll.u32 %s767_s12, 6 }
  0x5b   : > { %542 = vmatpush1.bf16.xpose.msra.mxu0 %v541_v17  ;;  %v277_v28 = vshrl.u32 %v276_v26, 7  ;;  %s233_s19 = scalar_lea.vmem [#allocation10], %s532_s21  ;;  %s996_s7 = scalar_lea.hbm %s1048_s2, %s534_s16 }
  0x5c   : > { %263 = vmax.xlane.f32.xlu0 %v262_v5  ;;  %544 = vmatprep.subr.bf16.mxu0 %v543_v21  ;;  %v275_v27 = vunpack.c.0.s8 %v274_v25  ;;  %s406_s30 = sshll.u32 %s233_s19, 4  ;;  %s392_s8 = scalar_lea.sflag [#allocation7], %s957_s6  ;;  %s998_s30 = int_to_ptr.vmem [resolvable:$true] %s406_s30 }
  0x5d   : > { %s689_s15 = scalar_lea.vmem %s998_s30, 64  ;;  %p1060_p5 = scmp.ne.s32.totalorder %s1053_s22, 0 }
  0x5e   : > { %v255_v8 = vld [vmem:[#allocation2] sm:$0xf]  ;;  %v278_v29 = vsub.s32 %v275_v27, %v277_v28  ;;  %p690_p0 = scmp.ne.s32.totalorder %s998_s30, %s689_s15  ;;  %s785_s12 = smov [#allocation10]  }
  0x5f   : > { %v284_v41 = vld [vmem:[#allocation3] sm:$0xf]  ;;  %s693_s18 = sshll.u32 %s785_s12, 4  ;;  %s694_s18 = int_to_ptr.vmem [resolvable:$false] %s693_s18 }
  0x60   : > { %p691_p7 = pnand %p690_p0, %p1060_p5  ;;  %s695_s4 = scalar_lea.vmem %s694_s18, 128 }
  0x61   : > { %v367_v47 = vld [vmem:[#allocation4] sm:$0xf]  ;;  %p696_p10 = scmp.lt.s32.totalorder %s998_s30, %s694_s18  ;;  %p697_p12 = scmp.lt.s32.totalorder %s695_s4, %s689_s15 }
  0x62   : > { %p692_p13 = pneg %p691_p7 }
  0x63   : > { %546 = vmatpush1.bf16.xpose.msra.mxu0 %v545_v23  ;;  %p698_p1 = por %p697_p12, %p696_p10 }
  0x65   : > { %p699_p2 = pnand %p698_p1, %p692_p13 }
  0xe9   : > { %v264_v9 = vpop.xlane.xlu0 %263 }
  0xea   : > { %v265_v10 = vmax.f32 %v255_v8, %v264_v9 }
  0xec   : > { %v266_v11 = vsub.f32 %v255_v8, %v265_v10  ;;  %377 = vst.msk [vmem:[#allocation2] sm:$0xf] %vm241_vm0, %v265_v10  ;;  %271 = vperm.xlu0 %620, %v265_v10  }
  0xee   : > { %v267_v39 = vmul.f32 1.442695, %v266_v11 }
 0x16b   : > { %v272_v30 = vpop.permute.xlu0 %271 }
 0x16c   : > { %v279_v31 = vrot.slane %v272_v30, %v278_v29 }
 0x16e   : > { %v281_v32 = vsub.f32 %v246_v1, %v279_v31 }
 0x170   : > { %v282_v33 = vmul.f32 1.442695, %v281_v32 }
 0x172   : > { %623 = vpow2.f32 %v282_v33 }
 0x173   : > { %625 = vpow2.f32 %v267_v39 }
 0x17c   : > { %v624_v34 = vpop.eup %623 }
 0x17d   : > { %v287_v35 = vcombine.high %v624_v34, %v624_v34  ;;  %v289_v36 = vsel %vm259_vm1, %v624_v34, 0.0  ;;  %v626_v40 = vpop.eup %625 }
 0x17e   : > { %v285_v42 = vmul.f32 %v626_v40, %v284_v41 }
 0x17f   : > { %361 = vmatprep.mubr.f32.mxu0 %v287_v35  ;;  %v290_v37 = vsel %vm259_vm1, %v287_v35, 0.0 }
 0x180   : > { %362 = vmatmul.mubr.f32.vlgmr.msra.gmra.mrb[0].mxu0 %v624_v34  ;;  %v291_v38 = vadd.f32 %v290_v37, %v289_v36 }
 0x182   : > { %292 = vadd.xlane.f32.xlu1 %v291_v38 }
 0x193   : > { %370 = vperm.xlu1 %621, %v626_v40  }
 0x20f   : > { %v293_v43 = vpop.xlane.xlu1 %292 }
 0x210   : > { %v294_v44 = vadd.f32 %v293_v43, %v285_v42 }
 0x212   : > { %296 = vst.msk [vmem:[#allocation3] sm:$0xf] %vm241_vm0, %v294_v44 }
 0x213   : > { %v371_v48 = vpop.permute.xlu1 %370 }
 0x214   : > { %v373_v49 = vmul.f32 %v371_v48, %v367_v47 }
 0x219   : > { %v381_v45 = vld [vmem:[#allocation3] sm:$0xf] }
 0x21a   : > { %627 = vrcp.f32 %v381_v45 }
 0x224   : > { %v628_v46 = vpop.eup %627 }
 0x225   : > { %386 = vperm.xlu1 %621, %v628_v46  }
 0x253   : > { %v363_v50 = vpop.f32.mrb[0].mxu0 }
 0x254   : > { %v374_v51 = vadd.f32 %v373_v49, %v363_v50  ;;  %v365_v52 = vpop.f32.mrb[1].mxu0 }
 0x256   : > { %376 = vst.msk [vmem:[#allocation4] sm:$0xf] %vm244_vm2, %v374_v51 }
 0x25d   : > { %v383_v53 = vld [vmem:[#allocation4] sm:$0xf] }
 0x2a4   : > { %v387_v54 = vpop.permute.xlu1 %386 }
 0x2a5   : > { %v389_v55 = vmul.f32 %v387_v54, %v383_v53 }
 0x2a7   : > { %390 = vst.msk [vmem:[%s233_s19] sm:$0xf] %vm244_vm2, %v389_v55 }
 0x2a8   : > { %702 = shalt.err (!%p699_p2)
}
 0x2a9   : > { %s703_s6 = scalar_lea.hbm %s996_s7, 64  ;;  %s707_s27 = scalar_lea.hbm %s1048_s2, 128 }
 0x2aa   : > { %p704_p9 = scmp.ne.s32.totalorder %s996_s7, %s703_s6  ;;  %p708_p6 = scmp.lt.u32.totalorder %s996_s7, %s1048_s2 }
 0x2ab   : > { %p709_p4 = scmp.lt.u32.totalorder %s707_s27, %s703_s6  ;;  %p711_p0 = scmp.lt.u32.totalorder %s703_s6, %s996_s7 }
 0x2ac   : > { %p705_p11 = pnand %p704_p9, %p1060_p5 }
 0x2ad   : > { %p710_p8 = por %p709_p4, %p708_p6 }
 0x2ae   : > { %p706_p3 = pneg %p705_p11 }
 0x2af   : > { %p712_p7 = por %p711_p0, %p710_p8 }
 0x2b1   : > { %p713_p13 = pnand %p712_p7, %p706_p3 }
 0x2b3   : > { %716 = shalt.err (!%p713_p13)
}
 0x2b4   : > { %551 = dma.vmem_to_hbm [thread:$0]  (%p1060_p5), %s998_s30, 64, %s996_s7, %s392_s8  }
 0x2b5 PF: > { %s418_s29 = sand.u32 1, %s755_s9   ;;  %p1061_p10 = scmp.ne.s32.totalorder %s1054_s24, 0 }
 0x2b6   : > { %p1062_p12 = scmp.ge.s32.totalorder %s775_s14, 2  ;;  %s419_s21 = scalar_lea.sflag [#allocation7], %s418_s29 }
 0x2b8   : > { %p561_p1 = pnand %p1062_p12, %p1061_p10 }
 0x2ba   : > { %750 = dma.done.wait (!%p561_p1), %s419_s21, 64  }
 0x2bb   : > { %752 = vsyncadd (!%p561_p1), %s419_s21, 4294967232  ;;  %s21_s14 = sadd.s32 1, %s775_s14   ;;  %s1063_s9 = smov %s759_s10 }
 0x2bc   : > { %p18_p2 = scmp.ge.s32.totalorder %s21_s14, 4   ;;  %s1064_s10 = smov %s763_s11 }
 0x2bd   : > { %s1065_s11 = smov %s857_s23  ;;  %s1066_s12 = smov %s771_s13 }
 0x2be   : > { %s1067_s13 = smov %s1069_s17  ;;  %20 = sbr.rel (!%p18_p2) target bundleno = 8 (0x8), region = 94 }
 0x2c5   :  { %424 = vsyncpa [#allocation6], 1 }
 0x2c6   :  { %426 = vsyncpa [#allocation6 + $0x1], 1 }
 0x2c7   :  { %427 = vsyncpa [#allocation9], 1 }
 0x2c8   :  { %429 = vsyncpa [#allocation9 + $0x1], 1 }
 0x2c9   :  { %430 = vsyncpa [#allocation7], 1 }
 0x2ca   :  { %432 = vsyncpa [#allocation7 + $0x1], 1 }

</bundles_post_ra>
